<compile_context>
chip_gen: v7x
topology: tpu7x:2x2x1
jax: 0.10.0
libtpu: 0.0.40
codegen_flags: <defaults>
</compile_context>

<pallas_src>
import functools

import numpy as np
import jax
import jax.numpy as jnp
from jax.experimental import pallas as pl
from jax.experimental.pallas import tpu as pltpu

_N_STREAMS = 8  # enc_mean, enc_std, prior_mean, prior_std, dec_mean, dec_std, x, msk
_TARGET_STEP_BYTES = 16 * 1024 * 1024  # aggregate input bytes per grid step


def _round_up(x, m):
    return ((x + m - 1) // m) * m


def _vrnn_loss_kernel(enc_m_ref, enc_s_ref, pri_m_ref, pri_s_ref,
                      dec_m_ref, dec_s_ref, x_ref, m_ref,
                      loss_ref, acc_ref, *,
                      beta, t_tile, blocks_per_split, t_total, needs_mask):
    t = pl.program_id(1)

    @pl.when(t == 0)
    def _():
        acc_ref[...] = jnp.zeros_like(acc_ref)

    f32 = jnp.float32
    enc_m = enc_m_ref[...].astype(f32)
    enc_s = enc_s_ref[...].astype(f32)
    pri_m = pri_m_ref[...].astype(f32)
    pri_s = pri_s_ref[...].astype(f32)
    dec_m = dec_m_ref[...].astype(f32)
    dec_s = dec_s_ref[...].astype(f32)
    x = x_ref[...].astype(f32)
    m = m_ref[...].astype(f32)

    # ---- KLD elementwise term (no divides: exp(a-b) and exp(-b)) ------------
    dmean = enc_m - pri_m
    kld_el = (pri_s - enc_s) + jnp.exp(enc_s - pri_s) \
        + dmean * dmean * jnp.exp(-pri_s) - 1.0

    # ---- NLL elementwise term: diagonal-covariance MVN ----------------------
    # covariance diag = exp(0.5 * dec_std * msk); quad = ((x - mu) * m)^2 / diag
    logv = 0.5 * dec_s * m
    r = (x - dec_m) * m
    quad = r * r * jnp.exp(-logv)

    term = 0.5 * (beta * kld_el + quad + logv)

    if needs_mask:
        # Mask out-of-range timestep rows with a select (NOT a multiply) so that
        # exp() of garbage in OOB/padded rows cannot turn into Inf*0 = NaN.
        c = pl.program_id(0)
        row0 = (c * blocks_per_split + t) * t_tile
        rows = row0 + jax.lax.broadcasted_iota(jnp.int32, term.shape, 0)
        term = jnp.where(rows < t_total, term, 0.0)

    # Per-step sublane partial reduce (XLU/VALU filler) into a tiny resident
    # f32 accumulator; the single cross-lane reduce happens only once below.
    acc_ref[...] += jnp.sum(term, axis=0, keepdims=True)

    @pl.when(t == pl.num_programs(1) - 1)
    def _():
        loss_ref[...] = jnp.sum(acc_ref[...], keepdims=True)


def vrnn_loss(enc_mean, enc_std, prior_mean, prior_std,
              dec_mean, dec_std, x, msk, beta=1.0, max_rows_per_step=None):
    """All inputs are float arrays of shape [T, B, D]. Returns scalar loss."""
    T, B, D = x.shape
    BD = B * D
    BDp = _round_up(BD, 128)  # physical lane footprint (VMEM sizing only)

    # ---- generation-aware VMEM budget / tile sizing --------------------------
    try:
        vmem_cap = int(pltpu.get_tpu_info().vmem_capacity_bytes)
    except Exception:
        vmem_cap = 64 * 1024 * 1024
    vmem_limit = max(16 * 1024 * 1024,
                     min(int(vmem_cap * 0.6), 100 * 1024 * 1024))

    in_bytes_per_row = 2 * _N_STREAMS * BDp * 4       # double-buffered inputs
    acc_bytes = 8 * BDp * 4                           # (1, BD) accumulator (padded)
    rows_vmem = ((int(vmem_limit * 0.8) - acc_bytes) // in_bytes_per_row) // 8 * 8
    rows_target = (_TARGET_STEP_BYTES // (_N_STREAMS * BDp * 4)) // 8 * 8

    if T <= 8:
        t_tile = T                                    # block == full T extent
    else:
        caps = [rows_vmem, rows_target, (T // 8) * 8]
        if max_rows_per_step is not None:
            caps.append(max(8, (int(max_rows_per_step) // 8) * 8))
        t_tile = max(8, min(caps))

    n_blocks = -(-T // t_tile)
    n_split = 2 if n_blocks >= 2 else 1               # v7x: 2 TensorCores
    bps = -(-n_blocks // n_split)                     # timestep blocks per core
    needs_mask = (n_blocks * t_tile != T) or (n_split * bps != n_blocks)

    if n_split * bps == n_blocks:
        in_map = lambda c, t: (c * bps + t, 0)
    else:
        # Clamp excess blocks of the last split onto a valid block; the row mask
        # zeroes their contribution.
        in_map = lambda c, t: (jnp.minimum(c * bps + t, n_blocks - 1), 0)

    # Free metadata-only reshape for contiguous [T, B, D] arrays.
    streams = [jnp.asarray(a).reshape(T, BD)
               for a in (enc_mean, enc_std, prior_mean, prior_std,
                         dec_mean, dec_std, x, msk)]

    kernel = functools.partial(
        _vrnn_loss_kernel, beta=float(beta), t_tile=t_tile,
        blocks_per_split=bps, t_total=T, needs_mask=needs_mask)

    bytes_in = sum(int(np.prod(a.shape)) * a.dtype.itemsize for a in streams)
    cost = pl.CostEstimate(flops=22 * T * BD, transcendentals=3 * T * BD,
                           bytes_accessed=bytes_in + n_split * 4)

    in_spec = pl.BlockSpec((t_tile, BD), in_map)
    partials = pl.pallas_call(
        kernel,
        out_shape=jax.ShapeDtypeStruct((n_split, 1, 1), jnp.float32),
        grid_spec=pltpu.PrefetchScalarGridSpec(
            num_scalar_prefetch=0,
            grid=(n_split, bps),
            in_specs=[in_spec] * _N_STREAMS,
            out_specs=pl.BlockSpec((None, 1, 1), lambda c, t: (c, 0, 0)),
            scratch_shapes=[pltpu.VMEM((1, BD), jnp.float32)]),
        compiler_params=pltpu.CompilerParams(
            dimension_semantics=("parallel", "arbitrary"),
            vmem_limit_bytes=int(vmem_limit)),
        cost_estimate=cost,
    )(*streams)

    const_term = 0.5 * float(T) * float(BD) * float(np.log(2.0 * np.pi))
    return (jnp.sum(partials) + jnp.float32(const_term)) / jnp.float32(B)


def vrnn_loss_reference(enc_mean, enc_std, prior_mean, prior_std,
                        dec_mean, dec_std, x, msk, beta=1.0):
    """Pure-JAX reference mirroring the PyTorch forward (isreconmsk=True)."""
    T, B, D = x.shape
    kld_el = (prior_std - enc_std
              + (jnp.exp(enc_std) + (enc_mean - prior_mean) ** 2)
              / jnp.exp(prior_std) - 1.0)
    kld_b = beta * 0.5 * jnp.sum(kld_el, axis=(0, 2))             # [B]

    mu = dec_mean * msk
    logv = 0.5 * dec_std * msk
    v = jnp.exp(logv)
    y = x * msk
    quad = jnp.sum((y - mu) ** 2 / v, axis=-1)                    # [T, B]
    logdet = jnp.sum(logv, axis=-1)                               # [T, B]
    log_prob = -0.5 * (quad + logdet + D * np.log(2.0 * np.pi))
    nll = -jnp.sum(log_prob)
    return jnp.mean(kld_b) + nll / B


if __name__ == "__main__":
    def make_inputs(key, T, B, D):
        keys = jax.random.split(key, 8)
        enc_mean = jax.random.normal(keys[0], (T, B, D), jnp.float32) * 0.5
        enc_std = jax.random.normal(keys[1], (T, B, D), jnp.float32) * 0.3
        prior_mean = jax.random.normal(keys[2], (T, B, D), jnp.float32) * 0.5
        prior_std = jax.random.normal(keys[3], (T, B, D), jnp.float32) * 0.3
        dec_mean = jax.random.normal(keys[4], (T, B, D), jnp.float32) * 0.5
        dec_std = jax.random.normal(keys[5], (T, B, D), jnp.float32) * 0.3
        x = jax.random.normal(keys[6], (T, B, D), jnp.float32)
        msk = jax.random.bernoulli(keys[7], 0.7, (T, B, D)).astype(jnp.float32)
        return (enc_mean, enc_std, prior_mean, prior_std,
                dec_mean, dec_std, x, msk)

    # Case 1: aligned single block. Case 2: T remainder + non-128 lane extent.
    # Case 3: small tile cap -> odd block count exercises the clamped duplicate
    #         block on the split axis. Case 4: natural 2-way split + remainder.
    cases = [((8, 8, 32), None),
             ((10, 4, 20), None),
             ((44, 4, 32), 16),
             ((70, 4, 96), None)]
    for (T, B, D), cap in cases:
        args = make_inputs(jax.random.PRNGKey(0), T, B, D)
        loss = vrnn_loss(*args, beta=1.0, max_rows_per_step=cap)
        jax.block_until_ready(loss)
        loss_ref = vrnn_loss_reference(*args, beta=1.0)
        assert np.allclose(np.asarray(loss), np.asarray(loss_ref),
                           rtol=3e-4, atol=1e-2), (T, B, D, loss, loss_ref)

    print("KERNEL_OK")
</pallas_src>

<mosaic_0001>
module attributes {stable_mosaic.version = 11 : i64} {
  func.func @_vrnn_loss_kernel(%arg0: i32, %arg1: i32, %arg2: memref<8x256xf32, #tpu.memory_space<vmem>>, %arg3: memref<8x256xf32, #tpu.memory_space<vmem>>, %arg4: memref<8x256xf32, #tpu.memory_space<vmem>>, %arg5: memref<8x256xf32, #tpu.memory_space<vmem>>, %arg6: memref<8x256xf32, #tpu.memory_space<vmem>>, %arg7: memref<8x256xf32, #tpu.memory_space<vmem>>, %arg8: memref<8x256xf32, #tpu.memory_space<vmem>>, %arg9: memref<8x256xf32, #tpu.memory_space<vmem>>, %arg10: memref<1x1x1xf32, #tpu.memory_space<vmem>>, %arg11: memref<1x256xf32, #tpu.memory_space<vmem>>) attributes {dimension_semantics = [#tpu.dimension_semantics<parallel>, #tpu.dimension_semantics<arbitrary>], iteration_bounds = array<i64: 1, 1>, scalar_prefetch = 0 : i64, scratch_operands = 1 : i64, tpu.core_type = #tpu.core_type<tc>, window_params = [{transform_indices = @transform_0, window_bounds = array<i64: 8, 256>}, {transform_indices = @transform_1, window_bounds = array<i64: 8, 256>}, {transform_indices = @transform_2, window_bounds = array<i64: 8, 256>}, {transform_indices = @transform_3, window_bounds = array<i64: 8, 256>}, {transform_indices = @transform_4, window_bounds = array<i64: 8, 256>}, {transform_indices = @transform_5, window_bounds = array<i64: 8, 256>}, {transform_indices = @transform_6, window_bounds = array<i64: 8, 256>}, {transform_indices = @transform_7, window_bounds = array<i64: 8, 256>}, {transform_indices = @transform_8, window_bounds = array<i64: 1, 1, 1>}]} {
    %c0_i32 = arith.constant 0 : i32
    %0 = arith.cmpi eq, %arg1, %c0_i32 : i32
    %1 = arith.extui %0 : i1 to i32
    %c0_i32_0 = arith.constant 0 : i32
    %2 = arith.cmpi ne, %1, %c0_i32_0 : i32
    scf.if %2 {
      %cst_28 = arith.constant 0.000000e+00 : f32
      %48 = vector.broadcast %cst_28 : f32 to vector<1x256xf32>
      %c0_29 = arith.constant 0 : index
      %c0_30 = arith.constant 0 : index
      %49 = vector.load %arg11[%c0_29, %c0_30] : memref<1x256xf32, #tpu.memory_space<vmem>>, vector<1x256xf32>
      tpu.vector_store %arg11[%c0_29, %c0_30], %48 {strides = array<i32>} : memref<1x256xf32, #tpu.memory_space<vmem>>, vector<1x256xf32>,
    } else {
    }
    %c0 = arith.constant 0 : index
    %c0_1 = arith.constant 0 : index
    %3 = vector.load %arg2[%c0, %c0_1] : memref<8x256xf32, #tpu.memory_space<vmem>>, vector<8x256xf32>
    %c0_2 = arith.constant 0 : index
    %c0_3 = arith.constant 0 : index
    %4 = vector.load %arg3[%c0_2, %c0_3] : memref<8x256xf32, #tpu.memory_space<vmem>>, vector<8x256xf32>
    %c0_4 = arith.constant 0 : index
    %c0_5 = arith.constant 0 : index
    %5 = vector.load %arg4[%c0_4, %c0_5] : memref<8x256xf32, #tpu.memory_space<vmem>>, vector<8x256xf32>
    %c0_6 = arith.constant 0 : index
    %c0_7 = arith.constant 0 : index
    %6 = vector.load %arg5[%c0_6, %c0_7] : memref<8x256xf32, #tpu.memory_space<vmem>>, vector<8x256xf32>
    %c0_8 = arith.constant 0 : index
    %c0_9 = arith.constant 0 : index
    %7 = vector.load %arg6[%c0_8, %c0_9] : memref<8x256xf32, #tpu.memory_space<vmem>>, vector<8x256xf32>
    %c0_10 = arith.constant 0 : index
    %c0_11 = arith.constant 0 : index
    %8 = vector.load %arg7[%c0_10, %c0_11] : memref<8x256xf32, #tpu.memory_space<vmem>>, vector<8x256xf32>
    %c0_12 = arith.constant 0 : index
    %c0_13 = arith.constant 0 : index
    %9 = vector.load %arg8[%c0_12, %c0_13] : memref<8x256xf32, #tpu.memory_space<vmem>>, vector<8x256xf32>
    %c0_14 = arith.constant 0 : index
    %c0_15 = arith.constant 0 : index
    %10 = vector.load %arg9[%c0_14, %c0_15] : memref<8x256xf32, #tpu.memory_space<vmem>>, vector<8x256xf32>
    %11 = arith.subf %3, %5 : vector<8x256xf32>
    %12 = arith.subf %6, %4 : vector<8x256xf32>
    %13 = arith.subf %4, %6 : vector<8x256xf32>
    %14 = math.exp %13 : vector<8x256xf32>
    %15 = arith.addf %12, %14 : vector<8x256xf32>
    %16 = arith.mulf %11, %11 : vector<8x256xf32>
    %cst = arith.constant 0.000000e+00 : f32
    %17 = vector.broadcast %cst : f32 to vector<8x256xf32>
    %18 = arith.subf %17, %6 : vector<8x256xf32>
    %19 = math.exp %18 : vector<8x256xf32>
    %20 = arith.mulf %16, %19 : vector<8x256xf32>
    %21 = arith.addf %15, %20 : vector<8x256xf32>
    %cst_16 = arith.constant 1.000000e+00 : f32
    %22 = vector.broadcast %cst_16 : f32 to vector<8x256xf32>
    %23 = arith.subf %21, %22 : vector<8x256xf32>
    %cst_17 = arith.constant 5.000000e-01 : f32
    %24 = vector.broadcast %cst_17 : f32 to vector<8x256xf32>
    %25 = arith.mulf %24, %8 : vector<8x256xf32>
    %26 = arith.mulf %25, %10 : vector<8x256xf32>
    %27 = arith.subf %9, %7 : vector<8x256xf32>
    %28 = arith.mulf %27, %10 : vector<8x256xf32>
    %29 = arith.mulf %28, %28 : vector<8x256xf32>
    %cst_18 = arith.constant 0.000000e+00 : f32
    %30 = vector.broadcast %cst_18 : f32 to vector<8x256xf32>
    %31 = arith.subf %30, %26 : vector<8x256xf32>
    %32 = math.exp %31 : vector<8x256xf32>
    %33 = arith.mulf %29, %32 : vector<8x256xf32>
    %cst_19 = arith.constant 1.000000e+00 : f32
    %34 = vector.broadcast %cst_19 : f32 to vector<8x256xf32>
    %35 = arith.mulf %34, %23 : vector<8x256xf32>
    %36 = arith.addf %35, %33 : vector<8x256xf32>
    %37 = arith.addf %36, %26 : vector<8x256xf32>
    %cst_20 = arith.constant 5.000000e-01 : f32
    %38 = vector.broadcast %cst_20 : f32 to vector<8x256xf32>
    %39 = arith.mulf %38, %37 : vector<8x256xf32>
    %c0_21 = arith.constant 0 : index
    %c0_22 = arith.constant 0 : index
    %40 = vector.load %arg11[%c0_21, %c0_22] : memref<1x256xf32, #tpu.memory_space<vmem>>, vector<1x256xf32>
    %cst_23 = arith.constant dense<0.000000e+00> : vector<256xf32>
    %41 = vector.multi_reduction <add>, %39, %cst_23 [0] : vector<8x256xf32> to vector<256xf32>
    %42 = vector.shape_cast %41 : vector<256xf32> to vector<1x256xf32>
    %43 = arith.addf %40, %42 : vector<1x256xf32>
    %c0_24 = arith.constant 0 : index
    %c0_25 = arith.constant 0 : index
    %44 = vector.load %arg11[%c0_24, %c0_25] : memref<1x256xf32, #tpu.memory_space<vmem>>, vector<1x256xf32>
    tpu.vector_store %arg11[%c0_24, %c0_25], %43 {strides = array<i32>} : memref<1x256xf32, #tpu.memory_space<vmem>>, vector<1x256xf32>,
    %c0_i32_26 = arith.constant 0 : i32
    %45 = arith.cmpi eq, %arg1, %c0_i32_26 : i32
    %46 = arith.extui %45 : i1 to i32
    %c0_i32_27 = arith.constant 0 : i32
    %47 = arith.cmpi ne, %46, %c0_i32_27 : i32
    scf.if %47 {
      %c0_28 = arith.constant 0 : index
      %c0_29 = arith.constant 0 : index
      %48 = vector.load %arg11[%c0_28, %c0_29] : memref<1x256xf32, #tpu.memory_space<vmem>>, vector<1x256xf32>
      %49 = vector.shape_cast %48 : vector<1x256xf32> to vector<1x1x256xf32>
      %cst_30 = arith.constant dense<0.000000e+00> : vector<1xf32>
      %50 = vector.multi_reduction <add>, %49, %cst_30 [1, 2] : vector<1x1x256xf32> to vector<1xf32>
      %51 = vector.shape_cast %50 : vector<1xf32> to vector<1x1x1xf32>
      %52 = vector.extract %51[0, 0, 0] : f32 from vector<1x1x1xf32>
      %53 = vector.broadcast %52 : f32 to vector<1x1xf32>
      %c0_31 = arith.constant 0 : index
      %c0_32 = arith.constant 0 : index
      %c0_33 = arith.constant 0 : index
      %54 = vector.load %arg10[%c0_31, %c0_32, %c0_33] : memref<1x1x1xf32, #tpu.memory_space<vmem>>, vector<1x1x1xf32>
      %55 = vector.shape_cast %54 : vector<1x1x1xf32> to vector<1x1xf32>
      %56 = vector.shape_cast %53 : vector<1x1xf32> to vector<1x1x1xf32>
      tpu.vector_store %arg10[%c0_31, %c0_32, %c0_33], %56 {strides = array<i32>} : memref<1x1x1xf32, #tpu.memory_space<vmem>>, vector<1x1x1xf32>,
    } else {
    }
    return
  }
  func.func @transform_0(%arg0: i32, %arg1: i32) -> (i32, i32) {
    %c1_i32 = arith.constant 1 : i32
    %0 = arith.muli %arg0, %c1_i32 : i32
    %1 = arith.addi %0, %arg1 : i32
    %c0_i32 = arith.constant 0 : i32
    %c0_i32_0 = arith.constant 0 : i32
    return %1, %c0_i32 : i32, i32
  }
  func.func @transform_1(%arg0: i32, %arg1: i32) -> (i32, i32) {
    %c1_i32 = arith.constant 1 : i32
    %0 = arith.muli %arg0, %c1_i32 : i32
    %1 = arith.addi %0, %arg1 : i32
    %c0_i32 = arith.constant 0 : i32
    %c0_i32_0 = arith.constant 0 : i32
    return %1, %c0_i32 : i32, i32
  }
  func.func @transform_2(%arg0: i32, %arg1: i32) -> (i32, i32) {
    %c1_i32 = arith.constant 1 : i32
    %0 = arith.muli %arg0, %c1_i32 : i32
    %1 = arith.addi %0, %arg1 : i32
    %c0_i32 = arith.constant 0 : i32
    %c0_i32_0 = arith.constant 0 : i32
    return %1, %c0_i32 : i32, i32
  }
  func.func @transform_3(%arg0: i32, %arg1: i32) -> (i32, i32) {
    %c1_i32 = arith.constant 1 : i32
    %0 = arith.muli %arg0, %c1_i32 : i32
    %1 = arith.addi %0, %arg1 : i32
    %c0_i32 = arith.constant 0 : i32
    %c0_i32_0 = arith.constant 0 : i32
    return %1, %c0_i32 : i32, i32
  }
  func.func @transform_4(%arg0: i32, %arg1: i32) -> (i32, i32) {
    %c1_i32 = arith.constant 1 : i32
    %0 = arith.muli %arg0, %c1_i32 : i32
    %1 = arith.addi %0, %arg1 : i32
    %c0_i32 = arith.constant 0 : i32
    %c0_i32_0 = arith.constant 0 : i32
    return %1, %c0_i32 : i32, i32
  }
  func.func @transform_5(%arg0: i32, %arg1: i32) -> (i32, i32) {
    %c1_i32 = arith.constant 1 : i32
    %0 = arith.muli %arg0, %c1_i32 : i32
    %1 = arith.addi %0, %arg1 : i32
    %c0_i32 = arith.constant 0 : i32
    %c0_i32_0 = arith.constant 0 : i32
    return %1, %c0_i32 : i32, i32
  }
  func.func @transform_6(%arg0: i32, %arg1: i32) -> (i32, i32) {
    %c1_i32 = arith.constant 1 : i32
    %0 = arith.muli %arg0, %c1_i32 : i32
    %1 = arith.addi %0, %arg1 : i32
    %c0_i32 = arith.constant 0 : i32
    %c0_i32_0 = arith.constant 0 : i32
    return %1, %c0_i32 : i32, i32
  }
  func.func @transform_7(%arg0: i32, %arg1: i32) -> (i32, i32) {
    %c1_i32 = arith.constant 1 : i32
    %0 = arith.muli %arg0, %c1_i32 : i32
    %1 = arith.addi %0, %arg1 : i32
    %c0_i32 = arith.constant 0 : i32
    %c0_i32_0 = arith.constant 0 : i32
    return %1, %c0_i32 : i32, i32
  }
  func.func @transform_8(%arg0: i32, %arg1: i32) -> (i32, i32, i32) {
    %c0_i32 = arith.constant 0 : i32
    %c0_i32_0 = arith.constant 0 : i32
    %c0_i32_1 = arith.constant 0 : i32
    return %arg0, %c0_i32, %c0_i32_0 : i32, i32, i32
  }
}

</mosaic_0001>

<bundles_post_ra>
// kernel: tpu_custom_call.1
= control target key start
LH: loop header
LB: loop body
LE: loop exit
PB: predicated region body
PF: predicated region fallthrough
CT: control target
= control target key end

     0   :  { %13 = vsyncpa [#allocation4], 0  ;;  %s712_s0 = inlined_call_operand.hbm [shape: f32[8,256], index: 0, kind: input, shape index: {}]   ;;  %s713_s1 = inlined_call_operand.hbm [shape: f32[8,256], index: 1, kind: input, shape index: {}]   ;;  %s714_s2 = inlined_call_operand.hbm [shape: f32[8,256], index: 2, kind: input, shape index: {}]   ;;  %s715_s3 = inlined_call_operand.hbm [shape: f32[8,256], index: 3, kind: input, shape index: {}]   ;;  %s716_s4 = inlined_call_operand.hbm [shape: f32[8,256], index: 4, kind: input, shape index: {}]   ;;  %s717_s5 = inlined_call_operand.vmem [shape: f32[8,256], index: 5, kind: input, shape index: {}]   ;;  %s718_s6 = inlined_call_operand.hbm [shape: f32[8,256], index: 6, kind: input, shape index: {}]   ;;  %s719_s7 = inlined_call_operand.hbm [shape: f32[8,256], index: 7, kind: input, shape index: {}]   ;;  %s720_s8 = inlined_call_operand.hbm [shape: f32[1,1,1], index: 8, kind: output, shape index: {}]  }
   0x1   :  { %14 = vsyncpa [#allocation7], 0 }
   0x2   :  { %15 = vsyncpa [#allocation10], 0 }
   0x3   :  { %16 = vsyncpa [#allocation13], 0 }
   0x4   :  { %17 = vsyncpa [#allocation5], 0  ;;  %s545_s27 = smov [#allocation6]   ;;  %s546_s29 = smov [#allocation9]  }
   0x5   :  { %s42_s28 = sshll.u32 %s545_s27, 4  ;;  %s70_s30 = sshll.u32 %s546_s29, 4  ;;  %s43_s28 = int_to_ptr.vmem [resolvable:$true] %s42_s28  ;;  %s71_s30 = int_to_ptr.vmem [resolvable:$true] %s70_s30 }
   0x6   :  { %s359_s11 = scalar_lea.hbm %s713_s1, 256 }
   0x7   :  { %p360_p0 = scmp.ne.s32.totalorder %s713_s1, %s359_s11  ;;  %p363_p1 = scmp.lt.u32.totalorder %s359_s11, %s713_s1 }
   0x9   :  { %p365_p2 = pnand %p363_p1, %p360_p0 }
   0xb   :  { %368 = shalt.err (!%p365_p2)
}
   0xc   :  { %s369_s16 = scalar_lea.vmem %s43_s28, 256  ;;  %p374_p4 = scmp.lt.s32.totalorder %s43_s28, %s43_s28 }
   0xd   :  { %p370_p3 = scmp.ne.s32.totalorder %s43_s28, %s369_s16  ;;  %p375_p5 = scmp.lt.s32.totalorder %s369_s16, %s369_s16 }
   0xf   :  { %p376_p6 = por %p375_p5, %p374_p4 }
  0x11   :  { %p377_p7 = pnand %p376_p6, %p370_p3 }
  0x13   :  { %380 = shalt.err (!%p377_p7)
}
  0x14   :  { %45 = dma.hbm_to_vmem [thread:$0]  %s713_s1, 256, %s43_s28, [#allocation7]  }
  0x15   :  { %s381_s21 = scalar_lea.hbm %s715_s3, 256 }
  0x16   :  { %p382_p8 = scmp.ne.s32.totalorder %s715_s3, %s381_s21  ;;  %p385_p9 = scmp.lt.u32.totalorder %s381_s21, %s715_s3 }
  0x18   :  { %p387_p10 = pnand %p385_p9, %p382_p8 }
  0x1a   :  { %390 = shalt.err (!%p387_p10)
}
  0x1b   :  { %s391_s26 = scalar_lea.vmem %s71_s30, 256  ;;  %p396_p12 = scmp.lt.s32.totalorder %s71_s30, %s71_s30 }
  0x1c   :  { %p392_p11 = scmp.ne.s32.totalorder %s71_s30, %s391_s26  ;;  %p397_p13 = scmp.lt.s32.totalorder %s391_s26, %s391_s26 }
  0x1e   :  { %p398_p0 = por %p397_p13, %p396_p12 }
  0x20   :  { %p399_p1 = pnand %p398_p0, %p392_p11 }
  0x22   :  { %402 = shalt.err (!%p399_p1)
}
  0x23   :  { %73 = dma.hbm_to_vmem [thread:$0]  %s715_s3, 256, %s71_s30, [#allocation10]  }
  0x24   :  { %s547_s28 = smov [#allocation12]   ;;  %s548_s9 = smov [#allocation3]  }
  0x25   :  { %s107_s29 = sshll.u32 %s547_s28, 4  ;;  %s28_s10 = sshll.u32 %s548_s9, 4  ;;  %s108_s29 = int_to_ptr.vmem [resolvable:$true] %s107_s29  ;;  %s29_s10 = int_to_ptr.vmem [resolvable:$true] %s28_s10 }
  0x26   :  { %s403_s13 = scalar_lea.hbm %s718_s6, 256 }
  0x27   :  { %p404_p2 = scmp.ne.s32.totalorder %s718_s6, %s403_s13  ;;  %p407_p3 = scmp.lt.u32.totalorder %s403_s13, %s718_s6 }
  0x29   :  { %p409_p4 = pnand %p407_p3, %p404_p2 }
  0x2b   :  { %412 = shalt.err (!%p409_p4)
}
  0x2c   :  { %s413_s3 = scalar_lea.vmem %s108_s29, 256  ;;  %p418_p6 = scmp.lt.s32.totalorder %s108_s29, %s108_s29 }
  0x2d   :  { %p414_p5 = scmp.ne.s32.totalorder %s108_s29, %s413_s3  ;;  %p419_p7 = scmp.lt.s32.totalorder %s413_s3, %s413_s3 }
  0x2f   :  { %p420_p8 = por %p419_p7, %p418_p6 }
  0x31   :  { %p421_p9 = pnand %p420_p8, %p414_p5 }
  0x33   :  { %424 = shalt.err (!%p421_p9)
}
  0x34   :  { %110 = dma.hbm_to_vmem [thread:$0]  %s718_s6, 256, %s108_s29, [#allocation13]  }
  0x35   :  { %s425_s21 = scalar_lea.hbm %s712_s0, 256 }
  0x36   :  { %p426_p10 = scmp.ne.s32.totalorder %s712_s0, %s425_s21  ;;  %p429_p11 = scmp.lt.u32.totalorder %s425_s21, %s712_s0 }
  0x38   :  { %p431_p12 = pnand %p429_p11, %p426_p10 }
  0x3a   :  { %434 = shalt.err (!%p431_p12)
}
  0x3b   :  { %s435_s26 = scalar_lea.vmem %s29_s10, 256  ;;  %p440_p0 = scmp.lt.s32.totalorder %s29_s10, %s29_s10 }
  0x3c   :  { %p436_p13 = scmp.ne.s32.totalorder %s29_s10, %s435_s26  ;;  %p441_p1 = scmp.lt.s32.totalorder %s435_s26, %s435_s26 }
  0x3e   :  { %p442_p2 = por %p441_p1, %p440_p0 }
  0x40   :  { %p443_p3 = pnand %p442_p2, %p436_p13 }
  0x42   :  { %446 = shalt.err (!%p443_p3)
}
  0x43   :  { %31 = dma.hbm_to_vmem [thread:$0]  %s712_s0, 256, %s29_s10, [#allocation4]  }
  0x44   :  { %s549_s27 = smov [#allocation8]   ;;  %s550_s29 = smov [#allocation11]  }
  0x45   :  { %s56_s28 = sshll.u32 %s549_s27, 4  ;;  %s84_s9 = sshll.u32 %s550_s29, 4  ;;  %s57_s28 = int_to_ptr.vmem [resolvable:$true] %s56_s28  ;;  %s85_s9 = int_to_ptr.vmem [resolvable:$true] %s84_s9 }
  0x46   :  { %s447_s13 = scalar_lea.hbm %s714_s2, 256 }
  0x47   :  { %p448_p4 = scmp.ne.s32.totalorder %s714_s2, %s447_s13  ;;  %p451_p5 = scmp.lt.u32.totalorder %s447_s13, %s714_s2 }
  0x49   :  { %p453_p6 = pnand %p451_p5, %p448_p4 }
  0x4b   :  { %456 = shalt.err (!%p453_p6)
}
  0x4c   :  { %s457_s0 = scalar_lea.vmem %s57_s28, 256  ;;  %p462_p8 = scmp.lt.s32.totalorder %s57_s28, %s57_s28 }
  0x4d   :  { %p458_p7 = scmp.ne.s32.totalorder %s57_s28, %s457_s0  ;;  %p463_p9 = scmp.lt.s32.totalorder %s457_s0, %s457_s0 }
  0x4f   :  { %p464_p10 = por %p463_p9, %p462_p8 }
  0x51   :  { %p465_p11 = pnand %p464_p10, %p458_p7 }
  0x53   :  { %468 = shalt.err (!%p465_p11)
}
  0x54   :  { %59 = dma.hbm_to_vmem [thread:$0]  %s714_s2, 256, %s57_s28, [#allocation7]  }
  0x55   :  { %s469_s19 = scalar_lea.hbm %s716_s4, 256 }
  0x56   :  { %p470_p12 = scmp.ne.s32.totalorder %s716_s4, %s469_s19  ;;  %p473_p13 = scmp.lt.u32.totalorder %s469_s19, %s716_s4 }
  0x58   :  { %p475_p0 = pnand %p473_p13, %p470_p12 }
  0x5a   :  { %478 = shalt.err (!%p475_p0)
}
  0x5b   :  { %s479_s24 = scalar_lea.vmem %s85_s9, 256  ;;  %p484_p2 = scmp.lt.s32.totalorder %s85_s9, %s85_s9 }
  0x5c   :  { %p480_p1 = scmp.ne.s32.totalorder %s85_s9, %s479_s24  ;;  %p485_p3 = scmp.lt.s32.totalorder %s479_s24, %s479_s24 }
  0x5e   :  { %p486_p4 = por %p485_p3, %p484_p2 }
  0x60   :  { %p487_p5 = pnand %p486_p4, %p480_p1 }
  0x62   :  { %490 = shalt.err (!%p487_p5)
}
  0x63   :  { %87 = dma.hbm_to_vmem [thread:$0]  %s716_s4, 256, %s85_s9, [#allocation10]  }
  0x64   :  { %s551_s26 = smov [#allocation14]   ;;  %s491_s28 = scalar_lea.hbm %s719_s7, 256 }
  0x65   :  { %s121_s6 = sshll.u32 %s551_s26, 4  ;;  %p492_p6 = scmp.ne.s32.totalorder %s719_s7, %s491_s28  ;;  %s122_s6 = int_to_ptr.vmem [resolvable:$true] %s121_s6 }
  0x66   :  { %p495_p7 = scmp.lt.u32.totalorder %s491_s28, %s719_s7 }
  0x68   :  { %p497_p8 = pnand %p495_p7, %p492_p6 }
  0x6a   :  { %500 = shalt.err (!%p497_p8)
}
  0x6b   :  { %s501_s14 = scalar_lea.vmem %s122_s6, 256  ;;  %p506_p10 = scmp.lt.s32.totalorder %s122_s6, %s122_s6 }
  0x6c   :  { %p502_p9 = scmp.ne.s32.totalorder %s122_s6, %s501_s14  ;;  %p507_p11 = scmp.lt.s32.totalorder %s501_s14, %s501_s14 }
  0x6e   :  { %p508_p12 = por %p507_p11, %p506_p10 }
  0x70   :  { %p509_p13 = pnand %p508_p12, %p502_p9 }
  0x72   :  { %512 = shalt.err (!%p509_p13)
}
  0x73   :  { %124 = dma.hbm_to_vmem [thread:$0]  %s719_s7, 256, %s122_s6, [#allocation13]  }
  0x74   :  { %535 = dma.done.wait [#allocation4], 256  }
  0x75   :  { %536 = vsyncadd [#allocation4], 4294967040 }
  0x76   :  { %537 = dma.done.wait [#allocation7], 512  }
  0x77   :  { %538 = vsyncadd [#allocation7], 4294966784 }
  0x78   :  { %539 = dma.done.wait [#allocation10], 512  }
  0x79   :  { %540 = vsyncadd [#allocation10], 4294966784 }
  0x7a   :  { %541 = dma.done.wait [#allocation13], 512  }
  0x7b   :  { %542 = vsyncadd [#allocation13], 4294966784  ;;  %v170_v0 = vlaneseq  ;;  %v552_v2 = vmov 0.0   ;;  %v177_v3 = vld [vmem:[#allocation6] sm:$0xff]  ;;  %v178_v4 = vld [vmem:[#allocation6 + $0x8] sm:$0xff]  ;;  %vm293_vm1 = vcmask 1040384  }
  0x7c   :  { %v181_v5 = vld [vmem:[#allocation9] sm:$0xff]  ;;  %v182_v6 = vld [vmem:[#allocation9 + $0x8] sm:$0xff]  ;;  %v186_v8 = vld [vmem:[%s717_s5 + $0x8] sm:$0xff]  ;;  %vm307_vm2 = vcmask 0  }
  0x7d   :  { %vm685_vm0 = vcmp.lt.s32.totalorder %v170_v0, 256  ;;  %v185_v7 = vld [vmem:[%s717_s5] sm:$0xff]  ;;  %v195_v9 = vsub.f32 %v177_v3, %v181_v5  ;;  %v196_v10 = vsub.f32 %v178_v4, %v182_v6  ;;  %v205_v12 = vsub.f32 0.0, %v181_v5  ;;  %v190_v14 = vld [vmem:[#allocation14 + $0x8] sm:$0xff]  ;;  %v187_v27 = vld [vmem:[#allocation12] sm:$0xff]  ;;  %s554_s5 = smov [#allocation15]  }
  0x7e   :  { %174 = vst.msk [vmem:[#allocation2] sm:$0x3] %vm685_vm0, %v552_v2  ;;  %v189_v11 = vld [vmem:[#allocation14] sm:$0xff]  ;;  %v206_v13 = vsub.f32 0.0, %v182_v6  ;;  %v217_v17 = vmul.f32 0.5, %v185_v7  ;;  %v218_v20 = vmul.f32 0.5, %v186_v8  ;;  %v193_v39 = vsub.f32 %v181_v5, %v177_v3 }
  0x7f   :  { %v197_v15 = vmul.f32 1.442695, %v195_v9  ;;  %v199_v16 = vmul.f32 1.442695, %v196_v10  ;;  %v207_v18 = vmul.f32 1.442695, %v205_v12  ;;  %v194_v40 = vsub.f32 %v182_v6, %v178_v4 }
  0x80   :  { %v209_v19 = vmul.f32 1.442695, %v206_v13  ;;  %v219_v21 = vmul.f32 %v217_v17, %v189_v11  ;;  %v175_v22 = vld [vmem:[#allocation3] sm:$0xff]  ;;  %v176_v23 = vld [vmem:[#allocation3 + $0x8] sm:$0xff]  ;;  %v220_v24 = vmul.f32 %v218_v20, %v190_v14  ;;  %v188_v31 = vld [vmem:[#allocation12 + $0x8] sm:$0xff]  ;;  %s315_s0 = sshll.u32 %s554_s5, 4  ;;  %s316_s0 = int_to_ptr.vmem [resolvable:$true] %s315_s0 }
  0x81   :  { %347 = vpow2.f32 %v197_v15  ;;  %v179_v25 = vld [vmem:[#allocation8] sm:$0xff]  ;;  %v180_v29 = vld [vmem:[#allocation8 + $0x8] sm:$0xff]  ;;  %s513_s3 = scalar_lea.vmem %s316_s0, 16  ;;  %s517_s30 = scalar_lea.vmem %s316_s0, 32 }
  0x82   :  { %349 = vpow2.f32 %v199_v16  ;;  %v183_v26 = vld [vmem:[#allocation11] sm:$0xff]  ;;  %v227_v28 = vsub.f32 0.0, %v219_v21  ;;  %v184_v30 = vld [vmem:[#allocation11 + $0x8] sm:$0xff]  ;;  %v228_v32 = vsub.f32 0.0, %v220_v24  ;;  %v191_v34 = vsub.f32 %v175_v22, %v179_v25  ;;  %p514_p0 = scmp.ne.s32.totalorder %s316_s0, %s513_s3  ;;  %p518_p1 = scmp.lt.s32.totalorder %s316_s0, %s316_s0 }
  0x83   :  { %351 = vpow2.f32 %v207_v18  ;;  %v221_v35 = vsub.f32 %v187_v27, %v183_v26  ;;  %v192_v37 = vsub.f32 %v176_v23, %v180_v29  ;;  %v222_v38 = vsub.f32 %v188_v31, %v184_v30  ;;  %p519_p2 = scmp.lt.s32.totalorder %s517_s30, %s513_s3 }
  0x84   :  { %353 = vpow2.f32 %v209_v19  ;;  %v229_v33 = vmul.f32 1.442695, %v227_v28  ;;  %v231_v36 = vmul.f32 1.442695, %v228_v32  ;;  %v203_v41 = vmul.f32 %v191_v34, %v191_v34 }
  0x85   :  { %v223_v42 = vmul.f32 %v221_v35, %v189_v11  ;;  %v204_v44 = vmul.f32 %v192_v37, %v192_v37  ;;  %v224_v45 = vmul.f32 %v222_v38, %v190_v14  ;;  %v553_v11 = vmov 1966171168   ;;  %v241_v26 = vld [vmem:[#allocation2] sm:$0x3]  ;;  %p520_p3 = por %p519_p2, %p518_p1 }
  0x86   :  { %355 = vpow2.f32 %v229_v33  ;;  %v258_v12 = vunpack.c.l.s4 %v553_v11  ;;  %v261_v18 = vshrl.u32 %v170_v0, 7 }
  0x87   :  { %357 = vpow2.f32 %v231_v36  ;;  %v225_v52 = vmul.f32 %v223_v42, %v223_v42  ;;  %v226_v54 = vmul.f32 %v224_v45, %v224_v45  ;;  %p521_p4 = pnand %p520_p3, %p514_p0 }
  0x88   :  { %v259_v17 = vunpack.c.0.s8 %v258_v12  ;;  %v285_v29 = vsub.s32 0, %v261_v18  ;;  %v289_v30 = vsub.s32 1, %v261_v18 }
  0x8a   :  { %v262_v23 = vsub.s32 %v259_v17, %v261_v18 }
  0x8b   :  { %v348_v43 = vpop.eup %347 }
  0x8c   :  { %v350_v46 = vpop.eup %349  ;;  %v201_v47 = vadd.f32 %v348_v43, %v193_v39 }
  0x8d   :  { %v352_v48 = vpop.eup %351  ;;  %v202_v49 = vadd.f32 %v350_v46, %v194_v40 }
  0x8e   :  { %v354_v50 = vpop.eup %353  ;;  %v211_v51 = vmul.f32 %v352_v48, %v203_v41 }
  0x8f   :  { %v212_v53 = vmul.f32 %v354_v50, %v204_v44 }
  0x90   :  { %v213_v55 = vadd.f32 %v211_v51, %v201_v47  ;;  %v356_v56 = vpop.eup %355 }
  0x91   :  { %v214_v57 = vadd.f32 %v212_v53, %v202_v49  ;;  %v358_v58 = vpop.eup %357  ;;  %v233_v60 = vmul.f32 %v356_v56, %v225_v52 }
  0x92   :  { %v333_v59 = vadd.f32 -1.0, %v213_v55  ;;  %v234_v62 = vmul.f32 %v358_v58, %v226_v54 }
  0x93   :  { %v334_v61 = vadd.f32 -1.0, %v214_v57 }
  0x94   :  { %v235_v63 = vadd.f32 %v333_v59, %v233_v60 }
  0x95   :  { %v236_v2 = vadd.f32 %v334_v61, %v234_v62 }
  0x96   :  { %v237_v3 = vadd.f32 %v235_v63, %v219_v21 }
  0x97   :  { %v238_v4 = vadd.f32 %v236_v2, %v220_v24 }
  0x98   :  { %v239_v5 = vmul.f32 0.5, %v237_v3 }
  0x99   :  { %v240_v6 = vmul.f32 0.5, %v238_v4 }
  0x9a   :  { %v242_v7 = vrot.slane %v239_v5, 4 }
  0x9b   :  { %v248_v8 = vrot.slane %v240_v6, 4 }
  0x9c   :  { %v243_v9 = vadd.f32 %v242_v7, %v239_v5 }
  0x9d   :  { %v249_v10 = vadd.f32 %v248_v8, %v240_v6 }
  0x9e   :  { %v244_v13 = vrot.slane %v243_v9, 2 }
  0x9f   :  { %v250_v14 = vrot.slane %v249_v10, 2 }
  0xa0   :  { %v245_v15 = vadd.f32 %v244_v13, %v243_v9 }
  0xa1   :  { %v251_v16 = vadd.f32 %v250_v14, %v249_v10 }
  0xa2   :  { %v246_v19 = vrot.slane %v245_v15, 1 }
  0xa3   :  { %v252_v20 = vrot.slane %v251_v16, 1 }
  0xa4   :  { %v247_v22 = vadd.f32 %v246_v19, %v245_v15 }
  0xa5   :  { %v253_v21 = vadd.f32 %v252_v20, %v251_v16 }
  0xa7   :  { %v256_v24 = vcombine.low %v247_v22, %v253_v21 }
  0xa9   :  { %v263_v25 = vrot.slane %v256_v24, %v262_v23 }
  0xab   :  { %v270_v27 = vrot.slane %v263_v25, %v262_v23 }
  0xad   :  { %v272_v28 = vadd.f32 %v270_v27, %v241_v26 }
  0xaf   :  { %277 = vst.msk [vmem:[#allocation2] sm:$0x3] %vm685_vm0, %v272_v28 }
  0xb6   :  { %v281_v31 = vld [vmem:[#allocation2] sm:$0x3] }
  0xb7   :  { %v286_v32 = vrot.slane %v281_v31, %v285_v29  ;;  %v290_v33 = vrot.slane %v281_v31, %v289_v30 }
  0xb9   :  { %v294_v0 = vsel %vm293_vm1, %v286_v32, 0.0  ;;  %v295_v34 = vsel %vm293_vm1, %v290_v33, 0.0 }
  0xba   :  { %v296_v35 = vadd.f32 %v295_v34, %v294_v0 }
  0xbc   :  { %297 = vadd.xlane.f32.xlu0 %v296_v35 }
 0x149   :  { %v298_v36 = vpop.xlane.xlu0 %297 }
 0x14a   :  { %v299_v37 = vrot.slane %v298_v36, 4 }
 0x14c   :  { %v300_v38 = vadd.f32 %v299_v37, %v298_v36 }
 0x14e   :  { %v301_v39 = vrot.slane %v300_v38, 2 }
 0x150   :  { %v302_v40 = vadd.f32 %v301_v39, %v300_v38 }
 0x152   :  { %v303_v41 = vrot.slane %v302_v40, 1 }
 0x154   :  { %v304_v42 = vadd.f32 %v303_v41, %v302_v40 }
 0x156   :  { %335 = vpush %v304_v42 }
 0x187   :  { %s336_s10 = spop %335 }
 0x188   :  { %v306_v1 = vstv %s336_s10 }
 0x189   :  { %308 = vst.msk [vmem:[#allocation15] sm:$0x1] %vm307_vm2, %v306_v1 }
 0x18a   :  { %524 = shalt.err (!%p521_p4)
}
 0x18b   :  { %s525_s20 = scalar_lea.hbm %s720_s8, 16 }
 0x18c   :  { %p526_p5 = scmp.ne.s32.totalorder %s720_s8, %s525_s20  ;;  %p529_p6 = scmp.lt.u32.totalorder %s525_s20, %s720_s8 }
 0x18e   :  { %p531_p7 = pnand %p529_p6, %p526_p5 }
 0x190   :  { %534 = shalt.err (!%p531_p7)
}
 0x191   :  { %318 = dma.vmem_to_hbm [thread:$0]  %s316_s0, 16, %s720_s8, [#allocation5]  }
 0x192   :  { %543 = dma.done.wait [#allocation5], 16  }
 0x193   :  { %544 = vsyncadd [#allocation5], 4294967280 }
 0x194   :  { %322 = vsyncpa [#allocation4], 1 }
 0x195   :  { %323 = vsyncpa [#allocation7], 1 }
 0x196   :  { %324 = vsyncpa [#allocation10], 1 }
 0x197   :  { %325 = vsyncpa [#allocation13], 1 }
 0x198   :  { %326 = vsyncpa [#allocation5], 1 }

</bundles_post_ra>
